<compile_context>
chip_gen: v7x
topology: tpu7x:2x2x1
jax: 0.10.0
libtpu: 0.0.40
codegen_flags: <defaults>
</compile_context>

<pallas_src>
import jax
import jax.numpy as jnp
from jax.experimental import pallas as pl
from jax.experimental.pallas import tpu as pltpu


PACK = 32          # logical rows packed per 128-lane row (32 * K=4 = 128)
MIN_TM = 24        # multiple of 8 (sublane rule) and of 3 (bias-pattern period)


def _mymodule_kernel(x_ref, w_ref, b_ref, o_ref):
    # x_ref : (TM, 128)  lane-packed input tile            -- pipelined over grid
    # w_ref : (128, 160) block-diagonal replicated W^T     -- grid invariant
    # b_ref : (TM, 160)  pre-tiled effective bias pattern  -- grid invariant
    # o_ref : (TM, 160)  lane-packed output tile
    y = jnp.dot(x_ref[...], w_ref[...], preferred_element_type=jnp.float32)
    o_ref[...] = jnp.clip(y + b_ref[...], 0.0, 1.0).astype(o_ref.dtype)


def mymodule_forward(x, param, weight, bias, *, tm=3072):
    """x: (B,3,4), param: (3,4), weight: (5,4), bias: (5,) -> (B,3,5)."""
    B, R, K = x.shape                      # R = 3, K = 4
    N = weight.shape[0]                    # 5
    M = B * R                              # logical rows
    Mp = pl.cdiv(M, PACK)                  # packed (128-lane) rows
    dtype = x.dtype

    # ---- tile size (in packed rows) ----
    if tm >= Mp:
        if Mp > MIN_TM:
            # mid/large: force >= 2 grid steps so v7x's two TensorCores both work
            tm = max(MIN_TM, (pl.cdiv(Mp, 2) // MIN_TM) * MIN_TM)
        else:
            tm = Mp                        # small: one full-extent block
    else:
        tm = max(MIN_TM, (tm // MIN_TM) * MIN_TM)

    n_blocks = pl.cdiv(Mp, tm)
    # Blocks after the first must start at a packed row that is a multiple of 3
    # (effective-bias pattern period) and of 8 (sublane rule).
    assert n_blocks == 1 or tm % MIN_TM == 0, "tile must be a multiple of 24"

    # ---- one-time packed operand construction (wrapper-side, tiny) ----
    wT = weight.T.astype(dtype)                                    # (4, 5)
    w_bd = jnp.kron(jnp.eye(PACK, dtype=dtype), wT)                # (128, 160)

    eff = param.astype(dtype) @ wT + bias.astype(dtype)            # (3, 5)
    idx = (PACK * jnp.arange(3)[:, None] + jnp.arange(PACK)[None, :]) % 3
    eff3 = eff[idx].reshape(3, PACK * N)                           # (3, 160) period
    b_tile = jnp.tile(eff3, (pl.cdiv(tm, 3), 1))[:tm]              # (tm, 160)

    # lane-pack x: (B,3,4) -> flat -> (Mp, 128).  Free view when M % 32 == 0,
    # otherwise a one-time tail pad.
    xflat = x.reshape(M * K)
    pad = Mp * PACK * K - M * K
    if pad:
        xflat = jnp.pad(xflat, (0, pad))
    xp = xflat.reshape(Mp, PACK * K)

    itemsize = int(jnp.dtype(dtype).itemsize)
    cost = pl.CostEstimate(
        flops=2 * M * K * N,
        transcendentals=0,
        bytes_accessed=M * (K + N) * itemsize + w_bd.size * itemsize
        + b_tile.size * itemsize,
    )

    out = pl.pallas_call(
        _mymodule_kernel,
        out_shape=jax.ShapeDtypeStruct((Mp, PACK * N), dtype),
        grid=(n_blocks,),
        in_specs=[
            pl.BlockSpec((tm, PACK * K), lambda i: (i, 0)),        # x (pipelined)
            pl.BlockSpec((PACK * K, PACK * N), lambda i: (0, 0)),  # W blockdiag (resident)
            pl.BlockSpec((tm, PACK * N), lambda i: (0, 0)),        # eff bias (resident)
        ],
        out_specs=pl.BlockSpec((tm, PACK * N), lambda i: (i, 0)),
        compiler_params=pltpu.CompilerParams(
            dimension_semantics=("parallel",),                     # v7x: 2 TCs split grid
        ),
        cost_estimate=cost,
    )(xp, w_bd, b_tile)

    # (Mp,160) -> (Mp*32, 5) is a free row-major view; slice off pad rows.
    return out.reshape(Mp * PACK, N)[:M].reshape(B, R, N)


if __name__ == "__main__":
    key = jax.random.PRNGKey(0)
    k_x, k_p, k_w, k_b = jax.random.split(key, 4)

    B = 2
    x = jax.random.normal(k_x, (B, 3, 4), dtype=jnp.float32)

    # Deterministic parameter init (same shapes as the PyTorch module).
    param = jax.random.uniform(k_p, (3, 4), dtype=jnp.float32)          # torch.rand(3,4)
    bound = 1.0 / jnp.sqrt(4.0)                                         # nn.Linear(4,5) init
    weight = jax.random.uniform(k_w, (5, 4), minval=-bound, maxval=bound,
                                dtype=jnp.float32)
    bias = jax.random.uniform(k_b, (5,), minval=-bound, maxval=bound,
                              dtype=jnp.float32)

    def ref_fn(xv):
        return jnp.clip((xv + param[None]) @ weight.T + bias, 0.0, 1.0)

    # Small shape: M = 6 -> Mp = 1, single full-extent block (padded to 32 rows).
    out = mymodule_forward(x, param, weight, bias)
    jax.block_until_ready(out)
    assert out.shape == (B, 3, 5)
    assert jnp.allclose(out, ref_fn(x), atol=1e-5), "mismatch vs reference (B=2)"

    # Multi-block + partial-final-tile + dual-TC path:
    # M = 900 -> Mp = 29 packed rows -> tm = 24 -> grid = (2,), blocks 24 + 5.
    B2 = 300
    x2 = jax.random.normal(jax.random.PRNGKey(1), (B2, 3, 4), dtype=jnp.float32)
    out2 = mymodule_forward(x2, param, weight, bias)
    jax.block_until_ready(out2)
    assert out2.shape == (B2, 3, 5)
    assert jnp.allclose(out2, ref_fn(x2), atol=1e-5), "mismatch vs reference (B=300)"

    print("KERNEL_OK")
</pallas_src>

<mosaic_0001>
module attributes {stable_mosaic.version = 11 : i64} {
  func.func @_mymodule_kernel(%arg0: i32, %arg1: memref<1x128xf32, #tpu.memory_space<vmem>>, %arg2: memref<128x160xf32, #tpu.memory_space<vmem>>, %arg3: memref<1x160xf32, #tpu.memory_space<vmem>>, %arg4: memref<1x160xf32, #tpu.memory_space<vmem>>) attributes {dimension_semantics = [#tpu.dimension_semantics<parallel>], iteration_bounds = array<i64: 1>, scalar_prefetch = 0 : i64, scratch_operands = 0 : i64, tpu.core_type = #tpu.core_type<tc>, window_params = [{transform_indices = @transform_0, window_bounds = array<i64: 1, 128>}, {pipeline_mode = #tpu.pipeline_mode<synchronous>, transform_indices = @transform_1, window_bounds = array<i64: 128, 160>}, {pipeline_mode = #tpu.pipeline_mode<synchronous>, transform_indices = @transform_2, window_bounds = array<i64: 1, 160>}, {transform_indices = @transform_3, window_bounds = array<i64: 1, 160>}]} {
    %c0 = arith.constant 0 : index
    %c0_0 = arith.constant 0 : index
    %0 = vector.load %arg1[%c0, %c0_0] : memref<1x128xf32, #tpu.memory_space<vmem>>, vector<1x128xf32>
    %c0_1 = arith.constant 0 : index
    %c0_2 = arith.constant 0 : index
    %1 = vector.load %arg2[%c0_1, %c0_2] : memref<128x160xf32, #tpu.memory_space<vmem>>, vector<128x160xf32>
    %cst = arith.constant dense<0.000000e+00> : vector<1x160xf32>
    %2 = tpu.matmul %0, %1, %cst {dimension_numbers = #tpu.dot_dimension_numbers<[1], [0], [0], [1], [0, 0, 1, 1], [], []>} : vector<1x128xf32>, vector<128x160xf32>, vector<1x160xf32> -> vector<1x160xf32>
    %c0_3 = arith.constant 0 : index
    %c0_4 = arith.constant 0 : index
    %3 = vector.load %arg3[%c0_3, %c0_4] : memref<1x160xf32, #tpu.memory_space<vmem>>, vector<1x160xf32>
    %4 = arith.addf %2, %3 : vector<1x160xf32>
    %cst_5 = arith.constant 0.000000e+00 : f32
    %cst_6 = arith.constant 1.000000e+00 : f32
    %5 = vector.broadcast %cst_5 : f32 to vector<1x160xf32>
    %6 = arith.maximumf %5, %4 : vector<1x160xf32>
    %7 = vector.broadcast %cst_6 : f32 to vector<1x160xf32>
    %8 = arith.minimumf %7, %6 : vector<1x160xf32>
    %c0_7 = arith.constant 0 : index
    %c0_8 = arith.constant 0 : index
    %9 = vector.load %arg4[%c0_7, %c0_8] : memref<1x160xf32, #tpu.memory_space<vmem>>, vector<1x160xf32>
    tpu.vector_store %arg4[%c0_7, %c0_8], %8 {strides = array<i32>} : memref<1x160xf32, #tpu.memory_space<vmem>>, vector<1x160xf32>,
    return
  }
  func.func @transform_0(%arg0: i32) -> (i32, i32) {
    %c0_i32 = arith.constant 0 : i32
    %c0_i32_0 = arith.constant 0 : i32
    return %arg0, %c0_i32 : i32, i32
  }
  func.func @transform_1(%arg0: i32) -> (i32, i32) {
    %c0_i32 = arith.constant 0 : i32
    %c0_i32_0 = arith.constant 0 : i32
    %c0_i32_1 = arith.constant 0 : i32
    return %c0_i32, %c0_i32_0 : i32, i32
  }
  func.func @transform_2(%arg0: i32) -> (i32, i32) {
    %c0_i32 = arith.constant 0 : i32
    %c0_i32_0 = arith.constant 0 : i32
    %c0_i32_1 = arith.constant 0 : i32
    return %c0_i32, %c0_i32_0 : i32, i32
  }
  func.func @transform_3(%arg0: i32) -> (i32, i32) {
    %c0_i32 = arith.constant 0 : i32
    %c0_i32_0 = arith.constant 0 : i32
    return %arg0, %c0_i32 : i32, i32
  }
}

</mosaic_0001>

<bundles_post_ra>
// kernel: tpu_custom_call.1
= control target key start
LH: loop header
LB: loop body
LE: loop exit
PB: predicated region body
PF: predicated region fallthrough
CT: control target
= control target key end

     0   :  { %v231_v7 = vmov 0.0   ;;  %s368_s0 = inlined_call_operand.vmem [shape: f32[1,128], index: 0, kind: input, shape index: {}]   ;;  %s369_s1 = inlined_call_operand.vmem [shape: f32[128,160], index: 1, kind: input, shape index: {}]   ;;  %s370_s2 = inlined_call_operand.vmem [shape: f32[1,160], index: 2, kind: input, shape index: {}]   ;;  %s371_s3 = inlined_call_operand.hbm [shape: f32[1,160], index: 3, kind: output, shape index: {}]  }
   0x1   :  { %v17_v0 = vld [vmem:[%s369_s1 + $0x8] sm:$0xff]  ;;  %v19_v1 = vld [vmem:[%s369_s1 + $0x18] sm:$0xff]  ;;  %v16_v2 = vld [vmem:[%s369_s1] sm:$0xff]  ;;  %124 = vmatprep.mubr.f32.mxu0 %v231_v7 }
   0x2   :  { %v172_v3 = vpack.c.bf16 %v19_v1, %v17_v0  ;;  %v18_v4 = vld [vmem:[%s369_s1 + $0x10] sm:$0xff]  ;;  %v21_v5 = vld [vmem:[%s369_s1 + $0x28] sm:$0xff]  ;;  %v23_v6 = vld [vmem:[%s369_s1 + $0x38] sm:$0xff] }
   0x3   :  { %v174_v8 = vpack.c.bf16 %v18_v4, %v16_v2  ;;  %v176_v9 = vpack.c.bf16 %v23_v6, %v21_v5  ;;  %v20_v10 = vld [vmem:[%s369_s1 + $0x20] sm:$0xff]  ;;  %v22_v11 = vld [vmem:[%s369_s1 + $0x30] sm:$0xff]  ;;  %v25_v12 = vld [vmem:[%s369_s1 + $0x48] sm:$0xff] }
   0x4   :  { %173 = vmatprep.subr.bf16.mxu0 %v172_v3  ;;  %v27_v13 = vld [vmem:[%s369_s1 + $0x58] sm:$0xff]  ;;  %v178_v14 = vpack.c.bf16 %v22_v11, %v20_v10  ;;  %v24_v16 = vld [vmem:[%s369_s1 + $0x40] sm:$0xff]  ;;  %v26_v17 = vld [vmem:[%s369_s1 + $0x50] sm:$0xff] }
   0x5   :  { %175 = vmatpush1.bf16.msra.mxu0 %v174_v8  ;;  %v180_v15 = vpack.c.bf16 %v27_v13, %v25_v12  ;;  %v29_v18 = vld [vmem:[%s369_s1 + $0x68] sm:$0xff]  ;;  %v31_v19 = vld [vmem:[%s369_s1 + $0x78] sm:$0xff]  ;;  %v182_v20 = vpack.c.bf16 %v26_v17, %v24_v16  ;;  %v28_v22 = vld [vmem:[%s369_s1 + $0x60] sm:$0xff] }
   0x6   :  { %177 = vmatprep.subr.bf16.mxu0 %v176_v9  ;;  %v184_v21 = vpack.c.bf16 %v31_v19, %v29_v18  ;;  %v30_v23 = vld [vmem:[%s369_s1 + $0x70] sm:$0xff]  ;;  %v33_v24 = vld [vmem:[%s369_s1 + $0x88] sm:$0xff]  ;;  %v35_v25 = vld [vmem:[%s369_s1 + $0x98] sm:$0xff] }
   0x9   :  { %179 = vmatpush1.bf16.msra.mxu0 %v178_v14 }
   0xa   :  { %181 = vmatprep.subr.bf16.mxu0 %v180_v15 }
   0xb   :  { %8 = vsyncpa [#allocation3], 0  ;;  %v186_v26 = vpack.c.bf16 %v30_v23, %v28_v22  ;;  %v188_v27 = vpack.c.bf16 %v35_v25, %v33_v24  ;;  %v32_v28 = vld [vmem:[%s369_s1 + $0x80] sm:$0xff]  ;;  %v34_v29 = vld [vmem:[%s369_s1 + $0x90] sm:$0xff]  ;;  %v50_v50 = vlaneseq  ;;  %v232_v57 = vmov 1966171168  }
   0xc   :  { %v37_v30 = vld [vmem:[%s369_s1 + $0xa8] sm:$0xff]  ;;  %v39_v31 = vld [vmem:[%s369_s1 + $0xb8] sm:$0xff]  ;;  %v190_v32 = vpack.c.bf16 %v34_v29, %v32_v28  ;;  %v36_v34 = vld [vmem:[%s369_s1 + $0xa0] sm:$0xff]  ;;  %v139_v58 = vunpack.c.l.s4 %v232_v57 }
   0xd   :  { %183 = vmatpush1.bf16.msra.mxu0 %v182_v20  ;;  %v192_v33 = vpack.c.bf16 %v39_v31, %v37_v30  ;;  %v38_v35 = vld [vmem:[%s369_s1 + $0xb0] sm:$0xff]  ;;  %v41_v36 = vld [vmem:[%s369_s1 + $0xc8] sm:$0xff]  ;;  %v43_v37 = vld [vmem:[%s369_s1 + $0xd8] sm:$0xff]  ;;  %v51_v51 = vshrl.u32 %v50_v50, 7  ;;  %vm155_vm0 = vcmp.lt.s32.totalorder %v50_v50, 160 }
   0xe   :  { %185 = vmatprep.subr.bf16.mxu0 %v184_v21  ;;  %v194_v38 = vpack.c.bf16 %v38_v35, %v36_v34  ;;  %v196_v39 = vpack.c.bf16 %v43_v37, %v41_v36  ;;  %v40_v40 = vld [vmem:[%s369_s1 + $0xc0] sm:$0xff]  ;;  %v42_v41 = vld [vmem:[%s369_s1 + $0xd0] sm:$0xff]  ;;  %v45_v42 = vld [vmem:[%s369_s1 + $0xe8] sm:$0xff]  ;;  %v140_v63 = vunpack.c.0.s8 %v139_v58 }
   0xf   :  { %v47_v43 = vld [vmem:[%s369_s1 + $0xf8] sm:$0xff]  ;;  %v198_v44 = vpack.c.bf16 %v42_v41, %v40_v40  ;;  %v44_v46 = vld [vmem:[%s369_s1 + $0xe0] sm:$0xff]  ;;  %v46_v47 = vld [vmem:[%s369_s1 + $0xf0] sm:$0xff]  ;;  %v52_v52 = vsub.s32 0, %v51_v51  ;;  %v56_v54 = vsub.s32 1, %v51_v51 }
  0x10   :  { %v200_v45 = vpack.c.bf16 %v47_v43, %v45_v42  ;;  %v202_v48 = vpack.c.bf16 %v46_v47, %v44_v46  ;;  %v15_v49 = vld [vmem:[%s368_s0] sm:$0x1]  ;;  %v143_v4 = vsub.s32 %v140_v63, %v51_v51  ;;  %s233_s0 = smov [#allocation2]  }
  0x11   :  { %187 = vmatpush1.bf16.msra.mxu0 %v186_v26  ;;  %v48_v53 = vld [vmem:[%s370_s2] sm:$0x3]  ;;  %s164_s1 = sshll.u32 %s233_s0, 4  ;;  %s165_s1 = int_to_ptr.vmem [resolvable:$true] %s164_s1 }
  0x12   :  { %189 = vmatprep.subr.bf16.mxu0 %v188_v27  ;;  %v53_v55 = vrot.slane %v48_v53, %v52_v52  ;;  %v57_v56 = vrot.slane %v48_v53, %v56_v54  ;;  %s207_s2 = scalar_lea.vmem %s165_s1, 32  ;;  %p212_p1 = scmp.lt.s32.totalorder %s165_s1, %s165_s1 }
  0x13   :  { %p208_p0 = scmp.ne.s32.totalorder %s165_s1, %s207_s2  ;;  %p213_p2 = scmp.lt.s32.totalorder %s207_s2, %s207_s2 }
  0x15   :  { %191 = vmatpush1.bf16.msra.mxu0 %v190_v32  ;;  %p214_p3 = por %p213_p2, %p212_p1 }
  0x16   :  { %193 = vmatprep.subr.bf16.mxu0 %v192_v33 }
  0x17   :  { %p215_p4 = pnand %p214_p3, %p208_p0 }
  0x19   :  { %195 = vmatpush1.bf16.msra.mxu0 %v194_v38 }
  0x1a   :  { %197 = vmatprep.subr.bf16.mxu0 %v196_v39 }
  0x1d   :  { %199 = vmatpush1.bf16.msra.mxu0 %v198_v44 }
  0x1e   :  { %201 = vmatprep.subr.bf16.mxu0 %v200_v45 }
  0x21   :  { %203 = vmatpush1.bf16.msra.mxu0 %v202_v48 }
  0x24   :  { %125 = vmatmul.mubr.f32.vlgmr.msra.gmra.mrb[0].mxu0 %v15_v49 }
  0xf7   :  { %v126_v59 = vpop.f32.mrb[0].mxu0 }
  0xf8   :  { %v127_v60 = vadd.f32 %v126_v59, %v53_v55  ;;  %v128_v61 = vpop.f32.mrb[1].mxu0 }
  0xf9   :  { %v129_v62 = vadd.f32 %v128_v61, %v57_v56 }
  0xfa   :  { %v131_v0 = vmax.f32 %v127_v60, 0.0 }
  0xfb   :  { %v132_v1 = vmax.f32 %v129_v62, 0.0 }
  0xfc   :  { %v133_v2 = vmin.f32 %v131_v0, 1.0 }
  0xfd   :  { %v134_v3 = vmin.f32 %v132_v1, 1.0 }
  0xff   :  { %v137_v5 = vcombine.low %v133_v2, %v134_v3 }
 0x101   :  { %v144_v6 = vrot.slane %v137_v5, %v143_v4 }
 0x103   :  { %v151_v7 = vrot.slane %v144_v6, %v143_v4 }
 0x105   :  { %157 = vst.msk [vmem:[#allocation2] sm:$0x3] %vm155_vm0, %v151_v7 }
 0x106   :  { %218 = shalt.err (!%p215_p4)
}
 0x107   :  { %s219_s28 = scalar_lea.hbm %s371_s3, 32 }
 0x108   :  { %p220_p5 = scmp.ne.s32.totalorder %s371_s3, %s219_s28  ;;  %p223_p6 = scmp.lt.u32.totalorder %s219_s28, %s371_s3 }
 0x10a   :  { %p225_p7 = pnand %p223_p6, %p220_p5 }
 0x10c   :  { %228 = shalt.err (!%p225_p7)
}
 0x10d   :  { %167 = dma.vmem_to_hbm [thread:$0]  %s165_s1, 32, %s371_s3, [#allocation3]  }
 0x10e   :  { %229 = dma.done.wait [#allocation3], 32  }
 0x10f   :  { %230 = vsyncadd [#allocation3], 4294967264 }
 0x110   :  { %171 = vsyncpa [#allocation3], 1 }

</bundles_post_ra>
